<compile_context>
chip_gen: v7x
topology: tpu7x:2x2x1
jax: 0.10.0
libtpu: 0.0.40
codegen_flags: <defaults>
</compile_context>

<pallas_src>
import jax
import jax.numpy as jnp
from jax import lax
from jax.experimental import pallas as pl
from jax.experimental.pallas import tpu as pltpu

_TILE_N = 8192   # lanes per grid step (f32: 32 x 8192 x 4B = 1 MiB per input block)
_TILE_R = 32     # rows per grid step (3 f32 accumulators = 12 vregs, no spill)


def _cdiv(a, b):
    return -(-a // b)


def _round_up(v, m):
    return _cdiv(v, m) * m


def _sublane_multiple(dtype):
    itemsize = jnp.dtype(dtype).itemsize
    return {4: 8, 2: 16, 1: 32}.get(itemsize, 8)


def _make_iou_sums_kernel(tile_r, tile_n, n_valid, k_per, need_mask):
    """Builds the kernel for one (tile_r, tile_n) configuration.

    acc_ref block: (3, tile_r, 128) f32, resident across the reduction axis
    (axis 2 of the grid).  Row 0: sum(x*y), row 1: sum(x), row 2: sum(y),
    each as 128 lane-partial sums (final cross-lane reduce happens outside).
    """
    n_chunks = tile_n // 128

    def kernel(x_ref, y_ref, acc_ref):
        @pl.when(pl.program_id(2) == 0)
        def _init():
            acc_ref[...] = jnp.zeros_like(acc_ref)

        if need_mask:
            c = pl.program_id(0)
            k = pl.program_id(2)
            # Number of valid lanes in this block (may be <= 0 for OOB tails).
            limit = n_valid - (c * k_per + k) * tile_n
            # Hoisted out of the fold (JAX does not CSE broadcast/iota).
            lane = lax.broadcasted_iota(jnp.int32, (tile_r, 128), 1)

        def body(j, carry):
            acc_i, acc_x, acc_y = carry
            sl = pl.ds(pl.multiple_of(j * 128, 128), 128)
            xc = x_ref[:, sl].astype(jnp.float32)
            yc = y_ref[:, sl].astype(jnp.float32)
            if need_mask:
                ok = lane < (limit - j * 128)
                xc = jnp.where(ok, xc, 0.0)
                yc = jnp.where(ok, yc, 0.0)
            # Pure VPU adds into register-resident accumulators.
            return (acc_i + xc * yc, acc_x + xc, acc_y + yc)

        zeros = jnp.zeros((tile_r, 128), jnp.float32)
        acc_i, acc_x, acc_y = lax.fori_loop(
            0, n_chunks, body, (zeros, zeros, zeros), unroll=True)

        # Single accumulator read-modify-write per grid step.
        acc_ref[0, :, :] = acc_ref[0, :, :] + acc_i
        acc_ref[1, :, :] = acc_ref[1, :, :] + acc_x
        acc_ref[2, :, :] = acc_ref[2, :, :] + acc_y

    return kernel


def _iou_sums(x2d, y2d):
    """x2d, y2d: (R, N) -> (inter, sum_x, sum_y), each shape (R,) float32."""
    R, N = x2d.shape
    if x2d.dtype == jnp.bool_:
        # TODO(synk): stream bool blocks directly once Mosaic i1 block loads are
        # guaranteed; this astype costs one extra HBM pass for bool inputs only.
        x2d = x2d.astype(jnp.int8)
        y2d = y2d.astype(jnp.int8)

    sub = _sublane_multiple(x2d.dtype)
    tile_r = _TILE_R if R >= _TILE_R else _round_up(R, sub)
    tile_n = min(_TILE_N, _round_up(N, 128))

    grid_r = _cdiv(R, tile_r)
    n_blocks = _cdiv(N, tile_n)

    # v7x megacore: with a single row tile, split the reduction 2-way over a
    # leading parallel axis.  If the lane-block count is odd, re-pick tile_n so
    # it becomes even (avoids fully out-of-range blocks / index clamping).
    if grid_r == 1 and n_blocks >= 3 and n_blocks % 2 == 1:
        tile_n = _round_up(_cdiv(N, n_blocks + 1), 128)
        n_blocks = _cdiv(N, tile_n)
    n_split = 2 if (grid_r == 1 and n_blocks >= 2 and n_blocks % 2 == 0) else 1
    k_per = n_blocks // n_split
    need_mask = (N % tile_n) != 0

    def in_map(c, i, k):
        return (i, c * k_per + k)

    out_rows = n_split * grid_r * tile_r
    kernel = _make_iou_sums_kernel(tile_r, tile_n, N, k_per, need_mask)

    acc = pl.pallas_call(
        kernel,
        out_shape=jax.ShapeDtypeStruct((3, out_rows, 128), jnp.float32),
        grid=(n_split, grid_r, k_per),            # reduction axis last
        in_specs=[
            pl.BlockSpec((tile_r, tile_n), in_map),
            pl.BlockSpec((tile_r, tile_n), in_map),
        ],
        # Same output block for every k -> resident accumulator; lane-dense.
        out_specs=pl.BlockSpec((3, tile_r, 128),
                               lambda c, i, k: (0, c * grid_r + i, 0)),
        compiler_params=pltpu.CompilerParams(
            dimension_semantics=("parallel", "parallel", "arbitrary")),
    )(x2d, y2d)

    sums = jnp.sum(acc, axis=-1)                            # (3, out_rows)
    sums = sums.reshape(3, n_split, grid_r * tile_r).sum(axis=1)
    # Rows >= R hold garbage from edge row-blocks; slice them away.
    return sums[0, :R], sums[1, :R], sums[2, :R]


def _single_iou(x, y):
    """IoU of a single mask (ndim < 3) -> scalar."""
    if x.ndim == 2:
        x2d, y2d = x, y                     # natural (H, W) layout, no copies
    else:
        x2d = x.reshape(1, -1)              # free row-major reshape, no padding
        y2d = y.reshape(1, -1)
    inter, sx, sy = _iou_sums(x2d, y2d)
    inter, sx, sy = jnp.sum(inter), jnp.sum(sx), jnp.sum(sy)
    # union == 0 (both masks empty) yields NaN, matching the reference.
    return inter / (sx + sy - inter)


def _per_sample_iou(inter, sx, sy):
    """Per-channel sums (..., C) -> (..., C + 2) = [mean_iou, tot_iou, ious]."""
    union = sx + sy - inter
    iou_c = inter / union
    mean_iou = jnp.mean(iou_c, axis=-1, keepdims=True)
    tot_iou = (jnp.sum(inter, axis=-1, keepdims=True)
               / jnp.sum(union, axis=-1, keepdims=True))
    return jnp.concatenate([mean_iou, tot_iou, iou_c], axis=-1)


def multi_channel_iou(x, y):
    """JAX/Pallas equivalent of IoU.forward."""
    if x.shape != y.shape:
        raise ValueError("Both tensors must have same shape")
    if x.ndim > 4:
        raise ValueError("Tensor shape must have at most 4 dimensions.")

    if x.ndim < 3:
        return _single_iou(x, y)

    if x.ndim == 3:
        if x.shape[0] == 1:
            return _single_iou(x[0], y[0])
        C = x.shape[0]
        inter, sx, sy = _iou_sums(x.reshape(C, -1), y.reshape(C, -1))
        return _per_sample_iou(inter, sx, sy)

    # ndim == 4: batch of multi-channel masks.
    B, C = x.shape[:2]
    if C == 1:
        # Mirrors the PyTorch recursion, which returns a scalar per sample.
        inter, sx, sy = _iou_sums(x.reshape(B, -1), y.reshape(B, -1))
        return inter / (sx + sy - inter)                          # (B,)
    inter, sx, sy = _iou_sums(x.reshape(B * C, -1), y.reshape(B * C, -1))
    inter = inter.reshape(B, C)
    sx = sx.reshape(B, C)
    sy = sy.reshape(B, C)
    return _per_sample_iou(inter, sx, sy)                          # (B, C + 2)


if __name__ == "__main__":
    key = jax.random.PRNGKey(0)
    kx, ky = jax.random.split(key)
    B, C, H, W = 2, 4, 16, 16
    # Deterministic binary masks (float32), NCHW like the PyTorch module.
    x = (jax.random.uniform(kx, (B, C, H, W)) > 0.5).astype(jnp.float32)
    y = (jax.random.uniform(ky, (B, C, H, W)) > 0.5).astype(jnp.float32)

    out = multi_channel_iou(x, y)          # (2, 6): [mean, total, iou_c0..c3]
    jax.block_until_ready(out)

    # Pure-JAX reference.
    ref_inter = jnp.sum(x * y, axis=(2, 3))
    ref_union = jnp.sum(x, axis=(2, 3)) + jnp.sum(y, axis=(2, 3)) - ref_inter
    ref_iou_c = ref_inter / ref_union
    ref = jnp.concatenate(
        [jnp.mean(ref_iou_c, axis=-1, keepdims=True),
         jnp.sum(ref_inter, axis=-1, keepdims=True)
         / jnp.sum(ref_union, axis=-1, keepdims=True),
         ref_iou_c], axis=-1)
    assert out.shape == (B, C + 2)
    assert jnp.allclose(out, ref, atol=1e-5), (out, ref)

    # Narrow-dtype path (bf16 masks halve HBM traffic; 0/1 is exact in bf16).
    out_bf16 = multi_channel_iou(x.astype(jnp.bfloat16), y.astype(jnp.bfloat16))
    jax.block_until_ready(out_bf16)
    assert jnp.allclose(out_bf16, ref, atol=1e-5), (out_bf16, ref)

    # Per-sample (3-D) path.
    out3 = multi_channel_iou(x[0], y[0])
    jax.block_until_ready(out3)
    assert jnp.allclose(out3, ref[0], atol=1e-5), (out3, ref[0])

    # Single-mask (2-D) path (exercises lane tail masking, W < 128).
    s = multi_channel_iou(x[0, 0], y[0, 0])
    jax.block_until_ready(s)
    ri = jnp.sum(x[0, 0] * y[0, 0])
    rr = ri / (jnp.sum(x[0, 0]) + jnp.sum(y[0, 0]) - ri)
    assert jnp.allclose(s, rr, atol=1e-5), (s, rr)

    # Split + tail-mask path: single row tile, 2 lane blocks, N % tile_n != 0.
    ks1, ks2 = jax.random.split(ky)
    xs = (jax.random.uniform(ks1, (2, 96, 96)) > 0.5).astype(jnp.float32)
    ys = (jax.random.uniform(ks2, (2, 96, 96)) > 0.5).astype(jnp.float32)
    outs = multi_channel_iou(xs, ys)
    jax.block_until_ready(outs)
    ri2 = jnp.sum(xs * ys, axis=(1, 2))
    ru2 = jnp.sum(xs, axis=(1, 2)) + jnp.sum(ys, axis=(1, 2)) - ri2
    rc2 = ri2 / ru2
    refs = jnp.concatenate(
        [jnp.mean(rc2, keepdims=True), (jnp.sum(ri2) / jnp.sum(ru2))[None], rc2],
        axis=-1)
    assert jnp.allclose(outs, refs, atol=1e-5), (outs, refs)

    print("KERNEL_OK")
</pallas_src>

<mosaic_0001>
module attributes {stable_mosaic.version = 11 : i64} {
  func.func @kernel(%arg0: i32, %arg1: i32, %arg2: i32, %arg3: memref<8x256xf32, #tpu.memory_space<vmem>>, %arg4: memref<8x256xf32, #tpu.memory_space<vmem>>, %arg5: memref<3x8x128xf32, #tpu.memory_space<vmem>>) attributes {dimension_semantics = [#tpu.dimension_semantics<parallel>, #tpu.dimension_semantics<parallel>, #tpu.dimension_semantics<arbitrary>], iteration_bounds = array<i64: 1, 1, 1>, scalar_prefetch = 0 : i64, scratch_operands = 0 : i64, tpu.core_type = #tpu.core_type<tc>, window_params = [{transform_indices = @transform_0, window_bounds = array<i64: 8, 256>}, {transform_indices = @transform_1, window_bounds = array<i64: 8, 256>}, {transform_indices = @transform_2, window_bounds = array<i64: 3, 8, 128>}]} {
    %c0_i32 = arith.constant 0 : i32
    %0 = arith.cmpi eq, %arg2, %c0_i32 : i32
    %1 = arith.extui %0 : i1 to i32
    %c0_i32_0 = arith.constant 0 : i32
    %2 = arith.cmpi ne, %1, %c0_i32_0 : i32
    scf.if %2 {
      %cst_22 = arith.constant 0.000000e+00 : f32
      %42 = vector.broadcast %cst_22 : f32 to vector<3x8x128xf32>
      %c0_23 = arith.constant 0 : index
      %c0_24 = arith.constant 0 : index
      %c0_25 = arith.constant 0 : index
      %43 = vector.load %arg5[%c0_23, %c0_24, %c0_25] : memref<3x8x128xf32, #tpu.memory_space<vmem>>, vector<3x8x128xf32>
      tpu.vector_store %arg5[%c0_23, %c0_24, %c0_25], %42 {strides = array<i32>} : memref<3x8x128xf32, #tpu.memory_space<vmem>>, vector<3x8x128xf32>,
    } else {
    }
    %cst = arith.constant 0.000000e+00 : f32
    %3 = vector.broadcast %cst : f32 to vector<8x128xf32>
    %c0_i32_1 = arith.constant 0 : i32
    %c128_i32 = arith.constant 128 : i32
    %4 = arith.muli %c0_i32_1, %c128_i32 : i32
    %5 = tpu.assume_multiple %4, 128 : i32
    %c0 = arith.constant 0 : index
    %6 = arith.index_cast %5 : i32 to index
    %7 = vector.load %arg3[%c0, %6] : memref<8x256xf32, #tpu.memory_space<vmem>>, vector<8x128xf32>
    %c0_2 = arith.constant 0 : index
    %8 = arith.index_cast %5 : i32 to index
    %9 = vector.load %arg4[%c0_2, %8] : memref<8x256xf32, #tpu.memory_space<vmem>>, vector<8x128xf32>
    %10 = arith.mulf %7, %9 : vector<8x128xf32>
    %11 = arith.addf %3, %10 : vector<8x128xf32>
    %12 = arith.addf %3, %7 : vector<8x128xf32>
    %13 = arith.addf %3, %9 : vector<8x128xf32>
    %c1_i32 = arith.constant 1 : i32
    %c128_i32_3 = arith.constant 128 : i32
    %14 = arith.muli %c1_i32, %c128_i32_3 : i32
    %15 = tpu.assume_multiple %14, 128 : i32
    %c0_4 = arith.constant 0 : index
    %16 = arith.index_cast %15 : i32 to index
    %17 = vector.load %arg3[%c0_4, %16] : memref<8x256xf32, #tpu.memory_space<vmem>>, vector<8x128xf32>
    %c0_5 = arith.constant 0 : index
    %18 = arith.index_cast %15 : i32 to index
    %19 = vector.load %arg4[%c0_5, %18] : memref<8x256xf32, #tpu.memory_space<vmem>>, vector<8x128xf32>
    %20 = arith.mulf %17, %19 : vector<8x128xf32>
    %21 = arith.addf %11, %20 : vector<8x128xf32>
    %22 = arith.addf %12, %17 : vector<8x128xf32>
    %23 = arith.addf %13, %19 : vector<8x128xf32>
    %c2_i32 = arith.constant 2 : i32
    %c0_6 = arith.constant 0 : index
    %c0_7 = arith.constant 0 : index
    %c0_8 = arith.constant 0 : index
    %24 = vector.load %arg5[%c0_6, %c0_7, %c0_8] : memref<3x8x128xf32, #tpu.memory_space<vmem>>, vector<1x8x128xf32>
    %25 = vector.shape_cast %24 : vector<1x8x128xf32> to vector<8x128xf32>
    %26 = arith.addf %25, %21 : vector<8x128xf32>
    %c0_9 = arith.constant 0 : index
    %c0_10 = arith.constant 0 : index
    %c0_11 = arith.constant 0 : index
    %27 = vector.load %arg5[%c0_9, %c0_10, %c0_11] : memref<3x8x128xf32, #tpu.memory_space<vmem>>, vector<1x8x128xf32>
    %28 = vector.shape_cast %27 : vector<1x8x128xf32> to vector<8x128xf32>
    %29 = vector.shape_cast %26 : vector<8x128xf32> to vector<1x8x128xf32>
    tpu.vector_store %arg5[%c0_9, %c0_10, %c0_11], %29 {strides = array<i32>} : memref<3x8x128xf32, #tpu.memory_space<vmem>>, vector<1x8x128xf32>,
    %c1 = arith.constant 1 : index
    %c0_12 = arith.constant 0 : index
    %c0_13 = arith.constant 0 : index
    %30 = vector.load %arg5[%c1, %c0_12, %c0_13] : memref<3x8x128xf32, #tpu.memory_space<vmem>>, vector<1x8x128xf32>
    %31 = vector.shape_cast %30 : vector<1x8x128xf32> to vector<8x128xf32>
    %32 = arith.addf %31, %22 : vector<8x128xf32>
    %c1_14 = arith.constant 1 : index
    %c0_15 = arith.constant 0 : index
    %c0_16 = arith.constant 0 : index
    %33 = vector.load %arg5[%c1_14, %c0_15, %c0_16] : memref<3x8x128xf32, #tpu.memory_space<vmem>>, vector<1x8x128xf32>
    %34 = vector.shape_cast %33 : vector<1x8x128xf32> to vector<8x128xf32>
    %35 = vector.shape_cast %32 : vector<8x128xf32> to vector<1x8x128xf32>
    tpu.vector_store %arg5[%c1_14, %c0_15, %c0_16], %35 {strides = array<i32>} : memref<3x8x128xf32, #tpu.memory_space<vmem>>, vector<1x8x128xf32>,
    %c2 = arith.constant 2 : index
    %c0_17 = arith.constant 0 : index
    %c0_18 = arith.constant 0 : index
    %36 = vector.load %arg5[%c2, %c0_17, %c0_18] : memref<3x8x128xf32, #tpu.memory_space<vmem>>, vector<1x8x128xf32>
    %37 = vector.shape_cast %36 : vector<1x8x128xf32> to vector<8x128xf32>
    %38 = arith.addf %37, %23 : vector<8x128xf32>
    %c2_19 = arith.constant 2 : index
    %c0_20 = arith.constant 0 : index
    %c0_21 = arith.constant 0 : index
    %39 = vector.load %arg5[%c2_19, %c0_20, %c0_21] : memref<3x8x128xf32, #tpu.memory_space<vmem>>, vector<1x8x128xf32>
    %40 = vector.shape_cast %39 : vector<1x8x128xf32> to vector<8x128xf32>
    %41 = vector.shape_cast %38 : vector<8x128xf32> to vector<1x8x128xf32>
    tpu.vector_store %arg5[%c2_19, %c0_20, %c0_21], %41 {strides = array<i32>} : memref<3x8x128xf32, #tpu.memory_space<vmem>>, vector<1x8x128xf32>,
    return
  }
  func.func @transform_0(%arg0: i32, %arg1: i32, %arg2: i32) -> (i32, i32) {
    %c1_i32 = arith.constant 1 : i32
    %0 = arith.muli %arg0, %c1_i32 : i32
    %1 = arith.addi %0, %arg2 : i32
    %c0_i32 = arith.constant 0 : i32
    return %arg1, %1 : i32, i32
  }
  func.func @transform_1(%arg0: i32, %arg1: i32, %arg2: i32) -> (i32, i32) {
    %c1_i32 = arith.constant 1 : i32
    %0 = arith.muli %arg0, %c1_i32 : i32
    %1 = arith.addi %0, %arg2 : i32
    %c0_i32 = arith.constant 0 : i32
    return %arg1, %1 : i32, i32
  }
  func.func @transform_2(%arg0: i32, %arg1: i32, %arg2: i32) -> (i32, i32, i32) {
    %c1_i32 = arith.constant 1 : i32
    %0 = arith.muli %arg0, %c1_i32 : i32
    %1 = arith.addi %0, %arg1 : i32
    %c0_i32 = arith.constant 0 : i32
    %c0_i32_0 = arith.constant 0 : i32
    %c0_i32_1 = arith.constant 0 : i32
    return %c0_i32, %1, %c0_i32_0 : i32, i32, i32
  }
}

</mosaic_0001>

<bundles_post_ra>
// kernel: tpu_custom_call.1
= control target key start
LH: loop header
LB: loop body
LE: loop exit
PB: predicated region body
PF: predicated region fallthrough
CT: control target
= control target key end

     0   :  { %7 = vsyncpa [#allocation3], 0  ;;  %s236_s0 = inlined_call_operand.hbm [shape: f32[8,256], index: 0, kind: input, shape index: {}]   ;;  %s237_s1 = inlined_call_operand.hbm [shape: f32[8,256], index: 1, kind: input, shape index: {}]   ;;  %s238_s2 = inlined_call_operand.hbm [shape: f32[3,8,128], index: 2, kind: output, shape index: {}]  }
   0x1   :  { %8 = vsyncpa [#allocation6], 0 }
   0x2   :  { %9 = vsyncpa [#allocation4], 0  ;;  %s180_s9 = smov [#allocation2]   ;;  %s181_s11 = smov [#allocation5]  }
   0x3   :  { %s20_s10 = sshll.u32 %s180_s9, 4  ;;  %s34_s12 = sshll.u32 %s181_s11, 4  ;;  %s21_s10 = int_to_ptr.vmem [resolvable:$true] %s20_s10  ;;  %s35_s12 = int_to_ptr.vmem [resolvable:$true] %s34_s12 }
   0x4   :  { %s108_s15 = scalar_lea.hbm %s236_s0, 256 }
   0x5   :  { %p109_p0 = scmp.ne.s32.totalorder %s236_s0, %s108_s15  ;;  %p112_p1 = scmp.lt.u32.totalorder %s108_s15, %s236_s0 }
   0x7   :  { %p114_p2 = pnand %p112_p1, %p109_p0 }
   0x9   :  { %117 = shalt.err (!%p114_p2)
}
   0xa   :  { %s118_s20 = scalar_lea.vmem %s21_s10, 256  ;;  %p123_p4 = scmp.lt.s32.totalorder %s21_s10, %s21_s10 }
   0xb   :  { %p119_p3 = scmp.ne.s32.totalorder %s21_s10, %s118_s20  ;;  %p124_p5 = scmp.lt.s32.totalorder %s118_s20, %s118_s20 }
   0xd   :  { %p125_p6 = por %p124_p5, %p123_p4 }
   0xf   :  { %p126_p7 = pnand %p125_p6, %p119_p3 }
  0x11   :  { %129 = shalt.err (!%p126_p7)
}
  0x12   :  { %23 = dma.hbm_to_vmem [thread:$0]  %s236_s0, 256, %s21_s10, [#allocation3]  }
  0x13   :  { %s130_s25 = scalar_lea.hbm %s237_s1, 256 }
  0x14   :  { %p131_p8 = scmp.ne.s32.totalorder %s237_s1, %s130_s25  ;;  %p134_p9 = scmp.lt.u32.totalorder %s130_s25, %s237_s1 }
  0x16   :  { %p136_p10 = pnand %p134_p9, %p131_p8 }
  0x18   :  { %139 = shalt.err (!%p136_p10)
}
  0x19   :  { %s140_s30 = scalar_lea.vmem %s35_s12, 256  ;;  %p145_p12 = scmp.lt.s32.totalorder %s35_s12, %s35_s12 }
  0x1a   :  { %p141_p11 = scmp.ne.s32.totalorder %s35_s12, %s140_s30  ;;  %p146_p13 = scmp.lt.s32.totalorder %s140_s30, %s140_s30 }
  0x1c   :  { %p147_p0 = por %p146_p13, %p145_p12 }
  0x1e   :  { %p148_p1 = pnand %p147_p0, %p141_p11 }
  0x20   :  { %151 = shalt.err (!%p148_p1)
}
  0x21   :  { %37 = dma.hbm_to_vmem [thread:$0]  %s237_s1, 256, %s35_s12, [#allocation6]  }
  0x22   :  { %174 = dma.done.wait [#allocation3], 256  }
  0x23   :  { %175 = vsyncadd [#allocation3], 4294967040 }
  0x24   :  { %176 = dma.done.wait [#allocation6], 256  }
  0x25   :  { %177 = vsyncadd [#allocation6], 4294967040  ;;  %v56_v0 = vld [vmem:[#allocation2] sm:$0xff]  ;;  %v57_v1 = vld [vmem:[#allocation5] sm:$0xff]  ;;  %s182_s4 = smov [#allocation7]  }
  0x26   :  { %v63_v2 = vld [vmem:[#allocation2 + $0x8] sm:$0xff]  ;;  %v58_v3 = vmul.f32 %v57_v1, %v56_v0  ;;  %v65_v4 = vld [vmem:[#allocation5 + $0x8] sm:$0xff]  ;;  %s89_s5 = sshll.u32 %s182_s4, 4  ;;  %s90_s5 = int_to_ptr.vmem [resolvable:$true] %s89_s5 }
  0x27   :  { %v68_v5 = vadd.f32 %v63_v2, %v56_v0  ;;  %v66_v6 = vmul.f32 %v65_v4, %v63_v2  ;;  %v69_v7 = vadd.f32 %v65_v4, %v57_v1  ;;  %s152_s1 = scalar_lea.vmem %s90_s5, 384  ;;  %p157_p3 = scmp.lt.s32.totalorder %s90_s5, %s90_s5 }
  0x28   :  { %p153_p2 = scmp.ne.s32.totalorder %s90_s5, %s152_s1  ;;  %p158_p4 = scmp.lt.s32.totalorder %s152_s1, %s152_s1 }
  0x29   :  { %v67_v8 = vadd.f32 %v66_v6, %v58_v3  ;;  %76 = vst [vmem:[#allocation7 + $0x8] sm:$0xff] %v68_v5  ;;  %80 = vst [vmem:[#allocation7 + $0x10] sm:$0xff] %v69_v7 }
  0x2a   :  { %p159_p5 = por %p158_p4, %p157_p3 }
  0x2b   :  { %72 = vst [vmem:[#allocation7] sm:$0xff] %v67_v8 }
  0x2c   :  { %p160_p6 = pnand %p159_p5, %p153_p2 }
  0x2e   :  { %163 = shalt.err (!%p160_p6)
}
  0x2f   :  { %s164_s8 = scalar_lea.hbm %s238_s2, 384 }
  0x30   :  { %p165_p7 = scmp.ne.s32.totalorder %s238_s2, %s164_s8  ;;  %p168_p8 = scmp.lt.u32.totalorder %s164_s8, %s238_s2 }
  0x32   :  { %p170_p9 = pnand %p168_p8, %p165_p7 }
  0x34   :  { %173 = shalt.err (!%p170_p9)
}
  0x35   :  { %s183_s13 = smov 128   ;;  %s184_s14 = smov 8  }
  0x36   :  { %95 = dma.vmem_to_hbm [thread:$0]  %s90_s5, 384, %s238_s2, [#allocation4], %s183_s13, %s183_s13, %s184_s14  }
  0x37   :  { %178 = dma.done.wait [#allocation4], 384  }
  0x38   :  { %179 = vsyncadd [#allocation4], 4294966912 }
  0x39   :  { %99 = vsyncpa [#allocation3], 1 }
  0x3a   :  { %100 = vsyncpa [#allocation6], 1 }
  0x3b   :  { %101 = vsyncpa [#allocation4], 1 }

</bundles_post_ra>
